<compile_context>
chip_gen: v6e
topology: v6e:2x2x1
jax: 0.10.0
libtpu: 0.0.40
codegen_flags: <defaults>
</compile_context>

<pallas_src>
import functools

import jax
import jax.numpy as jnp
from jax import lax
from jax.experimental import pallas as pl
from jax.experimental.pallas import tpu as pltpu


def get_padding(stride, in_dim, kernel_dim, out_dim=None, mode='SAME'):
    # Mirrors the PyTorch helper exactly.
    k = kernel_dim
    if out_dim is None:
        out_dim = (in_dim + stride - 1) // stride
    if mode.lower() == 'same':
        val = stride * (out_dim - 1) - in_dim + k
        if val % 2 == 0:
            p1, p2 = val // 2, val // 2
        else:
            p1, p2 = (val + 1) // 2, (val + 1) // 2
        return (p1, p2, p1, p2)
    raise ValueError(f"unsupported padding mode: {mode}")


def _apply_act(y, act):
    if act is None:
        return y
    if act == 'relu':
        return jnp.maximum(y, 0.0)
    if act == 'lrelu':
        return jnp.where(y > 0, y, 0.2 * y)      # nn.LeakyReLU(0.2) as in the module
    if act == 'sigmoid':
        return jax.nn.sigmoid(y)
    raise ValueError(f"unsupported act: {act}")


def _round_up(x, m):
    return ((x + m - 1) // m) * m


def _conv_mm_kernel(w_ref, p_ref, o_ref, *, act):
    # w_ref: (Fo_p, Kc_p)   p_ref: (Kc_p, N_TILE)   o_ref: (Fo_p, N_TILE)
    # Single fused MXU matmul per tile (bias folded into the contraction),
    # f32 accumulation, activation on the f32 result, cast on store.
    acc = jnp.dot(w_ref[...], p_ref[...], preferred_element_type=jnp.float32)
    acc = _apply_act(acc, act)
    o_ref[...] = acc.astype(o_ref.dtype)


# TODO(synk): BatchNorm2d / LayerNorm branches of Conv2DBlock (constructor flags,
# default False) and arbitrary `act()` module callables are not implemented.
@functools.partial(jax.jit,
                   static_argnames=('stride', 'padding', 'act', 'compute_dtype'))
def conv2d_block_forward(x, w, b, *, stride=2, padding=None, act=None,
                         compute_dtype=None):
    """Conv2DBlock.forward: F.pad -> Conv2d(kernel, stride) -> optional act.

    x: (B, C, H, W) NCHW, w: (Fo, C, K, K) OIHW, b: (Fo,).
    compute_dtype: matmul operand dtype (e.g. jnp.bfloat16 on v6e/v7x);
    accumulation is always f32 and the output keeps x.dtype.
    """
    B, C, H, W = x.shape
    Fo, Cw, K, K2 = w.shape
    assert Cw == C and K == K2
    S = stride
    if compute_dtype is None:
        compute_dtype = x.dtype

    # --- padding resolution, identical to the module's forward() ---
    if isinstance(padding, str):
        pad = get_padding(S, H, K, mode=padding)
    elif padding is None:
        pad = (0, 0, 0, 0)
    else:
        pad = tuple(padding)
    # F.pad 4-tuple pads the last dim first: (W_left, W_right, H_top, H_bottom)
    wl, wr, ht, hb = pad
    xp = jnp.pad(x, ((0, 0), (0, 0), (ht, hb), (wl, wr)))
    Hp, Wp = xp.shape[2], xp.shape[3]
    Ho = (Hp - K) // S + 1
    Wo = (Wp - K) // S + 1

    # --- wrapper-side im2col: strided tap slices -> (K*K*C, B*Ho*Wo) ---
    # Under jit the K*K slices + stack + transpose + reshape + pad fuse into one
    # XLA copy that writes the patch matrix a single time.
    # TODO(synk): a manual strided DMA gather inside the kernel would remove even
    # that one extra HBM pass over the (replicated-by-K*K) input.
    taps = []
    for kh in range(K):
        for kw in range(K):
            taps.append(xp[:, :, kh:kh + S * (Ho - 1) + 1:S,
                               kw:kw + S * (Wo - 1) + 1:S])   # (B, C, Ho, Wo)
    patches = jnp.stack(taps, axis=0)                         # (K*K, B, C, Ho, Wo)
    patches = patches.transpose(0, 2, 1, 3, 4).reshape(K * K * C, B * Ho * Wo)

    Kc = K * K * C
    N = B * Ho * Wo

    # Lane-dense weight matrix (Fo, K*K*C) in matching (kh, kw, c) row order;
    # bias folded in via one extra contraction entry (ones row in the patches).
    w_mat = jnp.transpose(w, (0, 2, 3, 1)).reshape(Fo, Kc)
    w_aug = jnp.concatenate([w_mat, b.reshape(Fo, 1)], axis=1)              # (Fo, Kc+1)
    p_aug = jnp.concatenate([patches, jnp.ones((1, N), patches.dtype)], 0)  # (Kc+1, N)

    # --- pad to native tile multiples (lane/sublane-dense blocks) ---
    op_bytes = jnp.dtype(compute_dtype).itemsize
    out_bytes = jnp.dtype(x.dtype).itemsize
    sub = {4: 8, 2: 16, 1: 32}.get(op_bytes, 8)     # native sublane multiple
    Fo_p = _round_up(Fo, sub)
    Kc_p = _round_up(Kc + 1, sub)

    # N tile: multiple of 128 lanes (unmasked vst, full MXU lanes).  Size it so the
    # total pipeline footprint (resident weights + 2x patch buffers + 2x output
    # buffers) stays <= ~16 MiB, comfortably under the default scoped-VMEM limit
    # (32 MiB) on v5e / v6e / v7x, and cap at 2048 lanes (per-step overhead is
    # already fully amortized there).
    budget = 16 << 20
    resident = Fo_p * Kc_p * op_bytes
    col_bytes = 2 * Kc_p * op_bytes + 2 * Fo_p * out_bytes
    n_tile = max(128, ((budget - resident) // col_bytes) // 128 * 128)
    n_tile = min(n_tile, 2048)
    n_tile = min(n_tile, _round_up(N, 128))
    Np = _round_up(N, n_tile)

    w_aug = jnp.pad(w_aug, ((0, Fo_p - Fo), (0, Kc_p - (Kc + 1)))).astype(compute_dtype)
    p_aug = jnp.pad(p_aug, ((0, Kc_p - (Kc + 1)), (0, Np - N))).astype(compute_dtype)

    out = pl.pallas_call(
        functools.partial(_conv_mm_kernel, act=act),
        out_shape=jax.ShapeDtypeStruct((Fo_p, Np), x.dtype),
        grid=(Np // n_tile,),
        in_specs=[
            # Weights stay VMEM-resident across the whole grid (constant index_map).
            pl.BlockSpec((Fo_p, Kc_p), lambda n: (0, 0)),
            pl.BlockSpec((Kc_p, n_tile), lambda n: (0, n)),
        ],
        out_specs=pl.BlockSpec((Fo_p, n_tile), lambda n: (0, n)),
        compiler_params=pltpu.CompilerParams(dimension_semantics=("parallel",)),
    )(w_aug, p_aug)

    # Crop padding and un-fold the (b, oh, ow) column order back to NCHW.
    out = out[:Fo, :N].reshape(Fo, B, Ho, Wo).transpose(1, 0, 2, 3)
    return out


def conv2d_block_reference(x, w, b, *, stride=2, padding=None, act=None):
    """Pure-JAX reference (lax conv, f32 accumulation) for correctness checking."""
    B, C, H, W = x.shape
    K = w.shape[2]
    if isinstance(padding, str):
        pad = get_padding(stride, H, K, mode=padding)
    elif padding is None:
        pad = (0, 0, 0, 0)
    else:
        pad = tuple(padding)
    wl, wr, ht, hb = pad
    xp = jnp.pad(x, ((0, 0), (0, 0), (ht, hb), (wl, wr)))
    y = lax.conv_general_dilated(
        xp, w, (stride, stride), 'VALID',
        dimension_numbers=('NCHW', 'OIHW', 'NCHW'),
        preferred_element_type=jnp.float32)
    y = y + b.astype(jnp.float32).reshape(1, -1, 1, 1)
    return _apply_act(y, act)


if __name__ == "__main__":
    key = jax.random.PRNGKey(0)
    kx, kw, kb = jax.random.split(key, 3)

    B, Cin, Cout, H, W, K, S = 2, 4, 8, 16, 16, 3, 2
    x = jax.random.normal(kx, (B, Cin, H, W), jnp.float32)

    # Deterministic param init (PyTorch-style uniform(-1/sqrt(fan_in), 1/sqrt(fan_in)))
    fan_in = Cin * K * K
    bound = 1.0 / (fan_in ** 0.5)
    w = jax.random.uniform(kw, (Cout, Cin, K, K), jnp.float32, -bound, bound)
    b = jax.random.uniform(kb, (Cout,), jnp.float32, -bound, bound)

    cfg = dict(stride=S, padding='SAME', act='lrelu')

    # f32 operands (matches reference tightly)
    out = conv2d_block_forward(x, w, b, **cfg)
    out = jax.block_until_ready(out)
    ref = conv2d_block_reference(x, w, b, **cfg)
    assert out.shape == (B, Cout, 8, 8), out.shape
    err = float(jnp.max(jnp.abs(out - ref)))
    assert jnp.allclose(out, ref, atol=1e-5, rtol=1e-5), err

    # bf16 operands / f32 accumulation (recommended path on v6e / v7x MXUs)
    out_bf16 = conv2d_block_forward(x, w, b, compute_dtype=jnp.bfloat16, **cfg)
    out_bf16 = jax.block_until_ready(out_bf16)
    ref_bf16 = conv2d_block_reference(x.astype(jnp.bfloat16), w.astype(jnp.bfloat16),
                                      b.astype(jnp.bfloat16), **cfg)
    err_bf16 = float(jnp.max(jnp.abs(out_bf16 - ref_bf16)))
    assert jnp.allclose(out_bf16, ref_bf16, atol=1e-2, rtol=1e-2), err_bf16

    print("KERNEL_OK")
</pallas_src>

<mosaic_0001>
module attributes {stable_mosaic.version = 11 : i64} {
  func.func @_conv_mm_kernel(%arg0: i32, %arg1: memref<8x40xf32, #tpu.memory_space<vmem>>, %arg2: memref<40x128xf32, #tpu.memory_space<vmem>>, %arg3: memref<8x128xf32, #tpu.memory_space<vmem>>) attributes {dimension_semantics = [#tpu.dimension_semantics<parallel>], iteration_bounds = array<i64: 1>, scalar_prefetch = 0 : i64, scratch_operands = 0 : i64, tpu.core_type = #tpu.core_type<tc>, window_params = [{pipeline_mode = #tpu.pipeline_mode<synchronous>, transform_indices = @transform_0, window_bounds = array<i64: 8, 40>}, {transform_indices = @transform_1, window_bounds = array<i64: 40, 128>}, {transform_indices = @transform_2, window_bounds = array<i64: 8, 128>}]} {
    %c0 = arith.constant 0 : index
    %c0_0 = arith.constant 0 : index
    %0 = vector.load %arg1[%c0, %c0_0] : memref<8x40xf32, #tpu.memory_space<vmem>>, vector<8x40xf32>
    %c0_1 = arith.constant 0 : index
    %c0_2 = arith.constant 0 : index
    %1 = vector.load %arg2[%c0_1, %c0_2] : memref<40x128xf32, #tpu.memory_space<vmem>>, vector<40x128xf32>
    %cst = arith.constant dense<0.000000e+00> : vector<8x128xf32>
    %2 = tpu.matmul %0, %1, %cst {dimension_numbers = #tpu.dot_dimension_numbers<[1], [0], [0], [1], [0, 0, 1, 1], [], []>} : vector<8x40xf32>, vector<40x128xf32>, vector<8x128xf32> -> vector<8x128xf32>
    %cst_3 = arith.constant 0.000000e+00 : f32
    %3 = vector.broadcast %cst_3 : f32 to vector<8x128xf32>
    %4 = arith.cmpf ogt, %2, %3 : vector<8x128xf32>
    %cst_4 = arith.constant 2.000000e-01 : f32
    %5 = vector.broadcast %cst_4 : f32 to vector<8x128xf32>
    %6 = arith.mulf %5, %2 : vector<8x128xf32>
    %7 = arith.select %4, %2, %6 : vector<8x128xi1>, vector<8x128xf32>
    %c0_5 = arith.constant 0 : index
    %c0_6 = arith.constant 0 : index
    %8 = vector.load %arg3[%c0_5, %c0_6] : memref<8x128xf32, #tpu.memory_space<vmem>>, vector<8x128xf32>
    tpu.vector_store %arg3[%c0_5, %c0_6], %7 {strides = array<i32>} : memref<8x128xf32, #tpu.memory_space<vmem>>, vector<8x128xf32>,
    return
  }
  func.func @transform_0(%arg0: i32) -> (i32, i32) {
    %c0_i32 = arith.constant 0 : i32
    %c0_i32_0 = arith.constant 0 : i32
    %c0_i32_1 = arith.constant 0 : i32
    return %c0_i32, %c0_i32_0 : i32, i32
  }
  func.func @transform_1(%arg0: i32) -> (i32, i32) {
    %c0_i32 = arith.constant 0 : i32
    %c0_i32_0 = arith.constant 0 : i32
    return %c0_i32, %arg0 : i32, i32
  }
  func.func @transform_2(%arg0: i32) -> (i32, i32) {
    %c0_i32 = arith.constant 0 : i32
    %c0_i32_0 = arith.constant 0 : i32
    return %c0_i32, %arg0 : i32, i32
  }
}

</mosaic_0001>

<bundles_post_ra>
// kernel: conv2d_block_forward.1
= control target key start
LH: loop header
LB: loop body
LE: loop exit
PB: predicated region body
PF: predicated region fallthrough
CT: control target
= control target key end

     0   :  { %v121_v0 = vmov 0.0   ;;  %vm122_vm0 = vmmov 0   ;;  %vm17_vm1 = vcmask 326656   ;;  %s159_s1 = inlined_call_operand.vmem [shape: f32[40,128], index: 1, kind: input, shape index: {}]   ;;  %s160_s0 = inlined_call_operand.vmem [shape: f32[8,40], index: 0, kind: input, shape index: {}]   ;;  %s161_s2 = inlined_call_operand.vmem [shape: f32[8,128], index: 2, kind: output, shape index: {}]  }
   0x1   :  { %106 = vmatprep.subr.mxu0 %v121_v0  ;;  %v16_v1 = vld [vmem:[%s159_s1 + $0x20] sm:$0xff]  ;;  %v15_v2 = vld [vmem:[%s159_s1 + $0x18] sm:$0xff]  ;;  %116 = vmatprep.mubr.msk.f32.mxu0 %vm122_vm0, %v121_v0  ;;  %v14_v3 = vld [vmem:[%s159_s1 + $0x10] sm:$0xff] }
   0x2   :  { %107 = vmatpush3.msra.mxu0 %v16_v1  ;;  %v13_v4 = vld [vmem:[%s159_s1 + $0x8] sm:$0xff]  ;;  %v12_v5 = vld [vmem:[%s159_s1] sm:$0xff] }
   0x3   :  { %108 = vmatprep.subr.mxu0 %v121_v0  ;;  %v11_v6 = vld [vmem:[%s160_s0] sm:$0xff] }
   0x4   :  { %109 = vmatpush3.msra.mxu0 %v15_v2 }
   0x5   :  { %110 = vmatprep.subr.mxu0 %v121_v0 }
   0x6   :  { %111 = vmatpush3.msra.mxu0 %v14_v3 }
   0x7   :  { %112 = vmatprep.subr.mxu0 %v121_v0 }
   0x8   :  { %113 = vmatpush3.msra.mxu0 %v13_v4 }
   0x9   :  { %114 = vmatprep.subr.mxu0 %v121_v0 }
   0xa   :  { %115 = vmatpush3.msra.mxu0 %v12_v5 }
   0xb   :  { %117 = vmatmul.mubr.msk.f32.vlgmr.msra.gmra.mxu0 %vm17_vm1, %v11_v6 }
  0xcb   :  { %v87_v7 = vpop.f32.mrf.mxu0 }
  0xcc   :  { %vm91_vm2 = vcmp.gt.f32.partialorder %v87_v7, 0.0  ;;  %v92_v8 = vmul.f32 0.2, %v87_v7 }
  0xcd   :  { %v118_v9 = vpop.f32.mrf.mxu0 }
  0xce   :  { %v93_v10 = vsel %vm91_vm2, %v87_v7, %v92_v8 }
  0xcf   :  { %94 = vst [vmem:[%s161_s2] sm:$0xff] %v93_v10 }

</bundles_post_ra>
